<compile_context>
chip_gen: v7x
topology: tpu7x:2x2x1
jax: 0.10.0
libtpu: 0.0.40
codegen_flags: <defaults>
</compile_context>

<pallas_src>
import jax
import jax.numpy as jnp
from jax.experimental import pallas as pl
from jax.experimental.pallas import tpu as pltpu

H1, H2 = 512, 256
LANE = 128


def _round_up(a, b):
    return pl.cdiv(a, b) * b


def regression_head_kernel(x_ref, w1_ref, b1_ref, w2_ref, b2_ref, w3_ref, b3_ref, o_ref):
    num_params = o_ref.shape[-1]

    # Layer 1: Linear(in_features, 512) + ReLU
    # bf16 MXU operands, f32 accumulation / bias / ReLU. Cast of x happens here (VPU),
    # hidden under the MXU, instead of a separate XLA pad+cast pass in HBM.
    x = x_ref[...].astype(jnp.bfloat16)
    h1 = jnp.dot(x, w1_ref[...], preferred_element_type=jnp.float32) + b1_ref[...]
    h1 = jnp.maximum(h1, 0.0)
    # TODO(synk): Dropout implemented as identity (eval mode); training-mode dropout would
    #             use pltpu.prng_seed + pltpu.stateful_bernoulli masking.

    # Layer 2: Linear(512, 256) + ReLU
    h2 = jnp.dot(h1.astype(jnp.bfloat16), w2_ref[...], preferred_element_type=jnp.float32) + b2_ref[...]
    h2 = jnp.maximum(h2, 0.0)

    # Layer 3: Linear(256, num_params). w3/b3 are lane-padded to 128 for the matmul;
    # only the first num_params columns are stored (out block last dim == full array dim).
    y = jnp.dot(h2.astype(jnp.bfloat16), w3_ref[...], preferred_element_type=jnp.float32) + b3_ref[...]
    o_ref[...] = y[:, :num_params]


def prepare_params(w1, b1, w2, b2, w3, b3):
    """One-time conversion: bf16 matmul operands, f32 biases, lane-padded layer-3 weights.

    Call once and reuse; doing this per forward call would re-read all f32 weights and
    write bf16 copies in a separate XLA pass before every kernel launch.
    """
    num_params = w3.shape[1]
    P = _round_up(num_params, LANE)
    return {
        "w1": w1.astype(jnp.bfloat16),
        "b1": jnp.reshape(b1, (1, -1)).astype(jnp.float32),
        "w2": w2.astype(jnp.bfloat16),
        "b2": jnp.reshape(b2, (1, -1)).astype(jnp.float32),
        "w3": jnp.pad(w3, ((0, 0), (0, P - num_params))).astype(jnp.bfloat16),
        "b3": jnp.pad(jnp.reshape(b3, (1, -1)), ((0, 0), (0, P - num_params))).astype(jnp.float32),
        "num_params": int(num_params),
    }


def regression_head(x, params, *, tm=512):
    B, K = x.shape
    num_params = params["num_params"]
    w1, b1 = params["w1"], params["b1"]
    w2, b2 = params["w2"], params["b2"]
    w3, b3 = params["w3"], params["b3"]
    P = w3.shape[1]

    # Batch tile: big (default 512, multiple of 128) so the pipeline is not
    # per-grid-step-overhead bound, but clamped to round_up(B, 8) so small batches
    # use a single right-sized tile and Bp - B stays small.
    tm = min(tm, _round_up(B, 8))
    Bp = _round_up(B, tm)

    # Pad the batch only when needed; x stays in its native dtype (cast in-kernel).
    x_p = x if Bp == B else jnp.pad(x, ((0, Bp - B), (0, 0)))

    grid = (Bp // tm,)

    # Weights / biases: same block every grid step -> resident in VMEM; single buffer
    # (no point double-buffering something that never changes).
    def resident(arr):
        return pl.BlockSpec(arr.shape, lambda i: (0, 0), pipeline_mode=pl.Buffered(1))

    itemsize_x = jnp.dtype(x_p.dtype).itemsize

    # Rough VMEM budget: 2x x-tile (double-buffered), 1x each resident weight/bias,
    # f32 intermediates (h1, h2, padded y), 2x output tile.
    vmem_est = (
        2 * tm * K * itemsize_x
        + (w1.size + w2.size + w3.size) * 2
        + (b1.size + b2.size + b3.size) * 4
        + tm * (H1 + H2 + P) * 4
        + 2 * tm * num_params * 4
    )
    vmem_limit = min(max(int(1.25 * vmem_est) + (2 << 20), 8 << 20), 32 << 20)

    flops = 2 * Bp * (K * H1 + H1 * H2 + H2 * P)
    bytes_accessed = (
        x_p.size * itemsize_x
        + (w1.size + w2.size + w3.size) * 2
        + (b1.size + b2.size + b3.size) * 4
        + Bp * num_params * 4
    )

    out = pl.pallas_call(
        regression_head_kernel,
        out_shape=jax.ShapeDtypeStruct((Bp, num_params), jnp.float32),
        grid=grid,
        in_specs=[
            pl.BlockSpec((tm, K), lambda i: (i, 0)),   # x: tiled over batch (double-buffered)
            resident(w1), resident(b1),
            resident(w2), resident(b2),
            resident(w3), resident(b3),
        ],
        out_specs=pl.BlockSpec((tm, num_params), lambda i: (i, 0)),
        compiler_params=pltpu.CompilerParams(
            # "parallel" is a no-op on v5e/v6e single-core; on v7x, if the profile shows
            # one idle TensorCore, switch this axis to pltpu.CORE_PARALLEL.
            dimension_semantics=("parallel",),
            vmem_limit_bytes=vmem_limit,
        ),
        cost_estimate=pl.CostEstimate(
            flops=flops, transcendentals=0, bytes_accessed=bytes_accessed
        ),
    )(x_p, w1, b1, w2, b2, w3, b3)

    return out[:B] if Bp != B else out


def init_params(key, in_features, num_params):
    """Deterministic synthetic init (PyTorch-Linear-like uniform bounds)."""
    ks = jax.random.split(key, 6)

    def linear(kw, kb, fan_in, fan_out):
        bound = 1.0 / jnp.sqrt(fan_in)
        w = jax.random.uniform(kw, (fan_in, fan_out), jnp.float32, -bound, bound)
        b = jax.random.uniform(kb, (1, fan_out), jnp.float32, -bound, bound)
        return w, b

    w1, b1 = linear(ks[0], ks[1], in_features, H1)
    w2, b2 = linear(ks[2], ks[3], H1, H2)
    w3, b3 = linear(ks[4], ks[5], H2, num_params)
    return w1, b1, w2, b2, w3, b3


if __name__ == "__main__":
    key = jax.random.PRNGKey(0)
    k_x, k_p = jax.random.split(key)

    B = 8
    in_features = 32
    num_params = 4

    x = jax.random.normal(k_x, (B, in_features), jnp.float32)
    w1, b1, w2, b2, w3, b3 = init_params(k_p, in_features, num_params)

    params = prepare_params(w1, b1, w2, b2, w3, b3)   # one-time weight prep
    out = regression_head(x, params)
    out = jax.block_until_ready(out)

    # Pure-JAX f32 reference; kernel uses bf16 matmul operands with f32 accumulation,
    # so allow a modest tolerance.
    h1 = jnp.maximum(x @ w1 + b1, 0.0)
    h2 = jnp.maximum(h1 @ w2 + b2, 0.0)
    ref = h2 @ w3 + b3
    assert out.shape == (B, num_params)
    assert jnp.allclose(out, ref, atol=5e-2, rtol=5e-2), float(jnp.max(jnp.abs(out - ref)))

    print("KERNEL_OK")
</pallas_src>

<mosaic_0001>
module attributes {stable_mosaic.version = 11 : i64} {
  func.func @regression_head_kernel(%arg0: i32, %arg1: memref<8x32xf32, #tpu.memory_space<vmem>>, %arg2: memref<32x512xbf16, #tpu.memory_space<vmem>>, %arg3: memref<1x512xf32, #tpu.memory_space<vmem>>, %arg4: memref<512x256xbf16, #tpu.memory_space<vmem>>, %arg5: memref<1x256xf32, #tpu.memory_space<vmem>>, %arg6: memref<256x128xbf16, #tpu.memory_space<vmem>>, %arg7: memref<1x128xf32, #tpu.memory_space<vmem>>, %arg8: memref<8x4xf32, #tpu.memory_space<vmem>>) attributes {dimension_semantics = [#tpu.dimension_semantics<parallel>], iteration_bounds = array<i64: 1>, scalar_prefetch = 0 : i64, scratch_operands = 0 : i64, tpu.core_type = #tpu.core_type<tc>, window_params = [{transform_indices = @transform_0, window_bounds = array<i64: 8, 32>}, {pipeline_mode = #tpu.pipeline_mode<synchronous>, transform_indices = @transform_1, window_bounds = array<i64: 32, 512>}, {pipeline_mode = #tpu.pipeline_mode<synchronous>, transform_indices = @transform_2, window_bounds = array<i64: 1, 512>}, {pipeline_mode = #tpu.pipeline_mode<synchronous>, transform_indices = @transform_3, window_bounds = array<i64: 512, 256>}, {pipeline_mode = #tpu.pipeline_mode<synchronous>, transform_indices = @transform_4, window_bounds = array<i64: 1, 256>}, {pipeline_mode = #tpu.pipeline_mode<synchronous>, transform_indices = @transform_5, window_bounds = array<i64: 256, 128>}, {pipeline_mode = #tpu.pipeline_mode<synchronous>, transform_indices = @transform_6, window_bounds = array<i64: 1, 128>}, {transform_indices = @transform_7, window_bounds = array<i64: 8, 4>}]} {
    %c0 = arith.constant 0 : index
    %c0_0 = arith.constant 0 : index
    %0 = vector.load %arg1[%c0, %c0_0] : memref<8x32xf32, #tpu.memory_space<vmem>>, vector<8x32xf32>
    %1 = arith.truncf %0 : vector<8x32xf32> to vector<8x32xbf16>
    %c0_1 = arith.constant 0 : index
    %c0_2 = arith.constant 0 : index
    %2 = vector.load %arg2[%c0_1, %c0_2] : memref<32x512xbf16, #tpu.memory_space<vmem>>, vector<32x512xbf16>
    %cst = arith.constant dense<0.000000e+00> : vector<8x512xf32>
    %3 = tpu.matmul %1, %2, %cst {dimension_numbers = #tpu.dot_dimension_numbers<[1], [0], [0], [1], [0, 0, 1, 1], [], []>} : vector<8x32xbf16>, vector<32x512xbf16>, vector<8x512xf32> -> vector<8x512xf32>
    %c0_3 = arith.constant 0 : index
    %c0_4 = arith.constant 0 : index
    %4 = vector.load %arg3[%c0_3, %c0_4] : memref<1x512xf32, #tpu.memory_space<vmem>>, vector<1x512xf32>
    %5 = vector.broadcast %4 : vector<1x512xf32> to vector<8x512xf32>
    %6 = arith.addf %3, %5 : vector<8x512xf32>
    %cst_5 = arith.constant 0.000000e+00 : f32
    %7 = vector.broadcast %cst_5 : f32 to vector<8x512xf32>
    %8 = arith.maximumf %6, %7 : vector<8x512xf32>
    %9 = arith.truncf %8 : vector<8x512xf32> to vector<8x512xbf16>
    %c0_6 = arith.constant 0 : index
    %c0_7 = arith.constant 0 : index
    %10 = vector.load %arg4[%c0_6, %c0_7] : memref<512x256xbf16, #tpu.memory_space<vmem>>, vector<512x256xbf16>
    %cst_8 = arith.constant dense<0.000000e+00> : vector<8x256xf32>
    %11 = tpu.matmul %9, %10, %cst_8 {dimension_numbers = #tpu.dot_dimension_numbers<[1], [0], [0], [1], [0, 0, 1, 1], [], []>} : vector<8x512xbf16>, vector<512x256xbf16>, vector<8x256xf32> -> vector<8x256xf32>
    %c0_9 = arith.constant 0 : index
    %c0_10 = arith.constant 0 : index
    %12 = vector.load %arg5[%c0_9, %c0_10] : memref<1x256xf32, #tpu.memory_space<vmem>>, vector<1x256xf32>
    %13 = vector.broadcast %12 : vector<1x256xf32> to vector<8x256xf32>
    %14 = arith.addf %11, %13 : vector<8x256xf32>
    %cst_11 = arith.constant 0.000000e+00 : f32
    %15 = vector.broadcast %cst_11 : f32 to vector<8x256xf32>
    %16 = arith.maximumf %14, %15 : vector<8x256xf32>
    %17 = arith.truncf %16 : vector<8x256xf32> to vector<8x256xbf16>
    %c0_12 = arith.constant 0 : index
    %c0_13 = arith.constant 0 : index
    %18 = vector.load %arg6[%c0_12, %c0_13] : memref<256x128xbf16, #tpu.memory_space<vmem>>, vector<256x128xbf16>
    %cst_14 = arith.constant dense<0.000000e+00> : vector<8x128xf32>
    %19 = tpu.matmul %17, %18, %cst_14 {dimension_numbers = #tpu.dot_dimension_numbers<[1], [0], [0], [1], [0, 0, 1, 1], [], []>} : vector<8x256xbf16>, vector<256x128xbf16>, vector<8x128xf32> -> vector<8x128xf32>
    %c0_15 = arith.constant 0 : index
    %c0_16 = arith.constant 0 : index
    %20 = vector.load %arg7[%c0_15, %c0_16] : memref<1x128xf32, #tpu.memory_space<vmem>>, vector<1x128xf32>
    %21 = vector.broadcast %20 : vector<1x128xf32> to vector<8x128xf32>
    %22 = arith.addf %19, %21 : vector<8x128xf32>
    %23 = vector.extract_strided_slice %22 {offsets = [0, 0], sizes = [8, 4], strides = [1, 1]} : vector<8x128xf32> to vector<8x4xf32>
    %c0_17 = arith.constant 0 : index
    %c0_18 = arith.constant 0 : index
    %24 = vector.load %arg8[%c0_17, %c0_18] : memref<8x4xf32, #tpu.memory_space<vmem>>, vector<8x4xf32>
    tpu.vector_store %arg8[%c0_17, %c0_18], %23 {strides = array<i32>} : memref<8x4xf32, #tpu.memory_space<vmem>>, vector<8x4xf32>,
    return
  }
  func.func @transform_0(%arg0: i32) -> (i32, i32) {
    %c0_i32 = arith.constant 0 : i32
    %c0_i32_0 = arith.constant 0 : i32
    return %arg0, %c0_i32 : i32, i32
  }
  func.func @transform_1(%arg0: i32) -> (i32, i32) {
    %c0_i32 = arith.constant 0 : i32
    %c0_i32_0 = arith.constant 0 : i32
    %c0_i32_1 = arith.constant 0 : i32
    return %c0_i32, %c0_i32_0 : i32, i32
  }
  func.func @transform_2(%arg0: i32) -> (i32, i32) {
    %c0_i32 = arith.constant 0 : i32
    %c0_i32_0 = arith.constant 0 : i32
    %c0_i32_1 = arith.constant 0 : i32
    return %c0_i32, %c0_i32_0 : i32, i32
  }
  func.func @transform_3(%arg0: i32) -> (i32, i32) {
    %c0_i32 = arith.constant 0 : i32
    %c0_i32_0 = arith.constant 0 : i32
    %c0_i32_1 = arith.constant 0 : i32
    return %c0_i32, %c0_i32_0 : i32, i32
  }
  func.func @transform_4(%arg0: i32) -> (i32, i32) {
    %c0_i32 = arith.constant 0 : i32
    %c0_i32_0 = arith.constant 0 : i32
    %c0_i32_1 = arith.constant 0 : i32
    return %c0_i32, %c0_i32_0 : i32, i32
  }
  func.func @transform_5(%arg0: i32) -> (i32, i32) {
    %c0_i32 = arith.constant 0 : i32
    %c0_i32_0 = arith.constant 0 : i32
    %c0_i32_1 = arith.constant 0 : i32
    return %c0_i32, %c0_i32_0 : i32, i32
  }
  func.func @transform_6(%arg0: i32) -> (i32, i32) {
    %c0_i32 = arith.constant 0 : i32
    %c0_i32_0 = arith.constant 0 : i32
    %c0_i32_1 = arith.constant 0 : i32
    return %c0_i32, %c0_i32_0 : i32, i32
  }
  func.func @transform_7(%arg0: i32) -> (i32, i32) {
    %c0_i32 = arith.constant 0 : i32
    %c0_i32_0 = arith.constant 0 : i32
    return %arg0, %c0_i32 : i32, i32
  }
}

</mosaic_0001>

<bundles_post_ra>
// kernel: tpu_custom_call.1
= control target key start
LH: loop header
LB: loop body
LE: loop exit
PB: predicated region body
PF: predicated region fallthrough
CT: control target
= control target key end

     0   :  { %12 = vsyncpa [#allocation3], 0  ;;  %s1385_s0 = inlined_call_operand.hbm [shape: f32[8,32], index: 0, kind: input, shape index: {}]   ;;  %s1386_s1 = inlined_call_operand.hbm [shape: bf16[32,512], index: 1, kind: input, shape index: {}]   ;;  %s1387_s2 = inlined_call_operand.vmem [shape: f32[1,512], index: 2, kind: input, shape index: {}]   ;;  %s1388_s3 = inlined_call_operand.hbm [shape: bf16[512,256], index: 3, kind: input, shape index: {}]   ;;  %s1389_s4 = inlined_call_operand.vmem [shape: f32[1,256], index: 4, kind: input, shape index: {}]   ;;  %s1390_s5 = inlined_call_operand.hbm [shape: bf16[256,128], index: 5, kind: input, shape index: {}]   ;;  %s1391_s6 = inlined_call_operand.vmem [shape: f32[1,128], index: 6, kind: input, shape index: {}]   ;;  %s1392_s7 = inlined_call_operand.vmem [shape: f32[8,4], index: 7, kind: output, shape index: {}]  }
   0x1   :  { %13 = vsyncpa [#allocation5], 0 }
   0x2   :  { %14 = vsyncpa [#allocation8], 0  ;;  %s1258_s24 = smov [#allocation4]   ;;  %s1164_s28 = scalar_lea.hbm %s1386_s1, 1024 }
   0x3   :  { %s30_s25 = sshll.u32 %s1258_s24, 4  ;;  %p1165_p0 = scmp.ne.s32.totalorder %s1386_s1, %s1164_s28  ;;  %s31_s25 = int_to_ptr.vmem [resolvable:$true] %s30_s25 }
   0x4   :  { %p1168_p1 = scmp.lt.u32.totalorder %s1164_s28, %s1386_s1 }
   0x6   :  { %p1170_p2 = pnand %p1168_p1, %p1165_p0 }
   0x8   :  { %1173 = shalt.err (!%p1170_p2)
}
   0x9   :  { %s1174_s10 = scalar_lea.vmem %s31_s25, 1024  ;;  %p1179_p4 = scmp.lt.s32.totalorder %s31_s25, %s31_s25 }
   0xa   :  { %p1175_p3 = scmp.ne.s32.totalorder %s31_s25, %s1174_s10  ;;  %p1180_p5 = scmp.lt.s32.totalorder %s1174_s10, %s1174_s10 }
   0xc   :  { %p1181_p6 = por %p1180_p5, %p1179_p4 }
   0xe   :  { %p1182_p7 = pnand %p1181_p6, %p1175_p3 }
  0x10   :  { %1185 = shalt.err (!%p1182_p7)
}
  0x11   :  { %s1259_s11 = smov 256   ;;  %s1260_s12 = smov 16  }
  0x12   :  { %36 = dma.hbm_to_vmem [thread:$0]  %s1386_s1, 1024, %s31_s25, [#allocation5], %s1259_s11, %s1259_s11, %s1260_s12  }
  0x13   :  { %s1261_s15 = smov [#allocation2]   ;;  %s1262_s17 = smov [#allocation6]  }
  0x14   :  { %s21_s16 = sshll.u32 %s1261_s15, 4  ;;  %s44_s18 = sshll.u32 %s1262_s17, 4  ;;  %s22_s16 = int_to_ptr.vmem [resolvable:$true] %s21_s16  ;;  %s45_s18 = int_to_ptr.vmem [resolvable:$true] %s44_s18 }
  0x15   :  { %s1186_s21 = scalar_lea.hbm %s1385_s0, 128 }
  0x16   :  { %p1187_p8 = scmp.ne.s32.totalorder %s1385_s0, %s1186_s21  ;;  %p1190_p9 = scmp.lt.u32.totalorder %s1186_s21, %s1385_s0 }
  0x18   :  { %p1192_p10 = pnand %p1190_p9, %p1187_p8 }
  0x1a   :  { %1195 = shalt.err (!%p1192_p10)
}
  0x1b   :  { %s1196_s1 = scalar_lea.vmem %s22_s16, 128  ;;  %p1201_p12 = scmp.lt.s32.totalorder %s22_s16, %s22_s16 }
  0x1c   :  { %p1197_p11 = scmp.ne.s32.totalorder %s22_s16, %s1196_s1  ;;  %p1202_p13 = scmp.lt.s32.totalorder %s1196_s1, %s1196_s1 }
  0x1e   :  { %p1203_p0 = por %p1202_p13, %p1201_p12 }
  0x20   :  { %p1204_p1 = pnand %p1203_p0, %p1197_p11 }
  0x22   :  { %1207 = shalt.err (!%p1204_p1)
}
  0x23   :  { %24 = dma.hbm_to_vmem [thread:$0]  %s1385_s0, 128, %s22_s16, [#allocation3]  }
  0x24   :  { %s1208_s30 = scalar_lea.hbm %s1388_s3, 8192 }
  0x25   :  { %p1209_p2 = scmp.ne.s32.totalorder %s1388_s3, %s1208_s30  ;;  %p1212_p3 = scmp.lt.u32.totalorder %s1208_s30, %s1388_s3 }
  0x27   :  { %p1214_p4 = pnand %p1212_p3, %p1209_p2 }
  0x29   :  { %1217 = shalt.err (!%p1214_p4)
}
  0x2a   :  { %s1218_s12 = scalar_lea.vmem %s45_s18, 8192  ;;  %p1223_p6 = scmp.lt.s32.totalorder %s45_s18, %s45_s18 }
  0x2b   :  { %p1219_p5 = scmp.ne.s32.totalorder %s45_s18, %s1218_s12  ;;  %p1224_p7 = scmp.lt.s32.totalorder %s1218_s12, %s1218_s12 }
  0x2d   :  { %p1225_p8 = por %p1224_p7, %p1223_p6 }
  0x2f   :  { %p1226_p9 = pnand %p1225_p8, %p1219_p5 }
  0x31   :  { %1229 = shalt.err (!%p1226_p9)
}
  0x32   :  { %s1263_s0 = smov 128   ;;  %s1264_s13 = smov 8  }
  0x33   :  { %50 = dma.hbm_to_vmem [thread:$0]  %s1388_s3, 8192, %s45_s18, [#allocation5], %s1263_s0, %s1263_s0, %s1264_s13  }
  0x34   :  { %s1265_s16 = smov [#allocation7]   ;;  %s1230_s21 = scalar_lea.hbm %s1390_s5, 2048 }
  0x35   :  { %s58_s17 = sshll.u32 %s1265_s16, 4  ;;  %p1231_p10 = scmp.ne.s32.totalorder %s1390_s5, %s1230_s21  ;;  %s59_s17 = int_to_ptr.vmem [resolvable:$true] %s58_s17 }
  0x36   :  { %p1234_p11 = scmp.lt.u32.totalorder %s1230_s21, %s1390_s5 }
  0x38   :  { %p1236_p12 = pnand %p1234_p11, %p1231_p10 }
  0x3a   :  { %1239 = shalt.err (!%p1236_p12)
}
  0x3b   :  { %s1240_s1 = scalar_lea.vmem %s59_s17, 2048  ;;  %p1245_p0 = scmp.lt.s32.totalorder %s59_s17, %s59_s17 }
  0x3c   :  { %p1241_p13 = scmp.ne.s32.totalorder %s59_s17, %s1240_s1  ;;  %p1246_p1 = scmp.lt.s32.totalorder %s1240_s1, %s1240_s1 }
  0x3e   :  { %p1247_p2 = por %p1246_p1, %p1245_p0 }
  0x40   :  { %p1248_p3 = pnand %p1247_p2, %p1241_p13 }
  0x42   :  { %1251 = shalt.err (!%p1248_p3)
}
  0x43   :  { %s1266_s3 = smov 64   ;;  %s1267_s18 = smov 4  }
  0x44   :  { %64 = dma.hbm_to_vmem [thread:$0]  %s1390_s5, 2048, %s59_s17, [#allocation8], %s1266_s3, %s1266_s3, %s1267_s18  }
  0x45   :  { %1252 = dma.done.wait [#allocation3], 128  }
  0x46   :  { %1253 = vsyncadd [#allocation3], 4294967168 }
  0x47   :  { %1254 = dma.done.wait [#allocation5], 9216  }
  0x48   :  { %1255 = vsyncadd [#allocation5], 4294958080 }
  0x49   :  { %1256 = dma.done.wait [#allocation8], 2048  }
  0x4a   :  { %1257 = vsyncadd [#allocation8], 4294965248  ;;  %v1268_v0 = vmov 0   ;;  %v1040_v1 = vld [vmem:[#allocation4 + $0x4] ss:$16 sps:$4 sm:$0xff]   ;;  %v80_v5 = vld [vmem:[#allocation2] sm:$0xff] }
  0x4b   :  { %188 = vmatprep.mubr.bf16.mxu0 %v1268_v0  ;;  %v1042_v2 = vld [vmem:[#allocation4] ss:$16 sps:$4 sm:$0xff]   ;;  %156 = vmatprep.subr.bf16.mxu0 %v1040_v1  ;;  %v1043_v3 = vld [vmem:[#allocation4 + $0x24] ss:$16 sps:$4 sm:$0xff]   ;;  %v1048_v6 = vld [vmem:[#allocation4 + $0xc] ss:$16 sps:$4 sm:$0xff]   ;;  %v81_v8 = vpack.c.bf16 %v80_v5, %v80_v5 }
  0x4c   :  { %v1045_v4 = vld [vmem:[#allocation4 + $0x20] ss:$16 sps:$4 sm:$0xff]   ;;  %157 = vmatpush1.bf16.msra.mxu0 %v1042_v2  ;;  %v1046_v7 = vld [vmem:[#allocation4 + $0x8] ss:$16 sps:$4 sm:$0xff]   ;;  %v1052_v9 = vld [vmem:[#allocation6 + $0x4] ss:$8 sps:$4 sm:$0xff]  }
  0x4d   :  { %158 = vmatprep.subr.bf16.mxu0 %v1043_v3  ;;  %v1054_v10 = vld [vmem:[#allocation6] ss:$8 sps:$4 sm:$0xff]   ;;  %vm152_vm0 = vcmask 261120   ;;  %v1055_v11 = vld [vmem:[#allocation6 + $0x14] ss:$8 sps:$4 sm:$0xff]   ;;  %642 = vmatprep.subr.bf16.mxu1 %v1052_v9  ;;  %vm903_vm1 = vcmask 31744  }
  0x4e   :  { %v1051_v12 = vld [vmem:[#allocation4 + $0x2c] ss:$16 sps:$4 sm:$0xff]   ;;  %643 = vmatpush1.bf16.msra.mxu1 %v1054_v10  ;;  %v1057_v13 = vld [vmem:[#allocation6 + $0x10] ss:$8 sps:$4 sm:$0xff]   ;;  %v1063_v17 = vld [vmem:[#allocation6 + $0x20] ss:$8 sps:$4 sm:$0xff]  }
  0x4f   :  { %644 = vmatprep.subr.bf16.mxu1 %v1055_v11  ;;  %v1058_v14 = vld [vmem:[#allocation6 + $0x24] ss:$8 sps:$4 sm:$0xff]   ;;  %v1049_v15 = vld [vmem:[#allocation4 + $0x28] ss:$16 sps:$4 sm:$0xff]   ;;  %v1064_v18 = vld [vmem:[#allocation6 + $0x34] ss:$8 sps:$4 sm:$0xff]  }
  0x50   :  { %159 = vmatpush1.bf16.msra.mxu0 %v1045_v4  ;;  %v1062_v16 = vld [vmem:[#allocation6 + $0x104] ss:$8 sps:$4 sm:$0xff]   ;;  %v1060_v19 = vld [vmem:[#allocation6 + $0x100] ss:$8 sps:$4 sm:$0xff]   ;;  %v1068_v20 = vld [vmem:[#allocation6 + $0x114] ss:$8 sps:$4 sm:$0xff]  }
  0x51   :  { %197 = vmatprep.subr.bf16.mxu0 %v1048_v6  ;;  %v1069_v21 = vld [vmem:[#allocation6 + $0x30] ss:$8 sps:$4 sm:$0xff]   ;;  %v1070_v22 = vld [vmem:[#allocation6 + $0x44] ss:$8 sps:$4 sm:$0xff]   ;;  %v1075_v25 = vld [vmem:[#allocation6 + $0x40] ss:$8 sps:$4 sm:$0xff]  }
  0x52   :  { %645 = vmatpush1.bf16.msra.mxu1 %v1057_v13  ;;  %v1066_v23 = vld [vmem:[#allocation6 + $0x110] ss:$8 sps:$4 sm:$0xff]   ;;  %v1074_v24 = vld [vmem:[#allocation6 + $0x124] ss:$8 sps:$4 sm:$0xff]   ;;  %v1076_v26 = vld [vmem:[#allocation6 + $0x54] ss:$8 sps:$4 sm:$0xff]  }
  0x53   :  { %920 = vmatmul.mubr.msk.bf16.vlgmr.msra.gmra.mrb[0].mxu0 %vm152_vm0, %v81_v8  ;;  %646 = vmatprep.subr.bf16.mxu1 %v1058_v14  ;;  %v1072_v27 = vld [vmem:[#allocation6 + $0x120] ss:$8 sps:$4 sm:$0xff]   ;;  %v1080_v28 = vld [vmem:[#allocation6 + $0x134] ss:$8 sps:$4 sm:$0xff]   ;;  %v1081_v29 = vld [vmem:[#allocation6 + $0x50] ss:$8 sps:$4 sm:$0xff]  }
  0x54   :  { %198 = vmatpush1.bf16.msra.mxu0 %v1046_v7  ;;  %229 = vmatprep.mubr.bf16.mxu0 %v1268_v0  ;;  %v1082_v30 = vld [vmem:[#allocation6 + $0x64] ss:$8 sps:$4 sm:$0xff]   ;;  %v1078_v31 = vld [vmem:[#allocation6 + $0x130] ss:$8 sps:$4 sm:$0xff]   ;;  %v1087_v33 = vld [vmem:[#allocation6 + $0x60] ss:$8 sps:$4 sm:$0xff]  }
  0x55   :  { %199 = vmatprep.subr.bf16.mxu0 %v1051_v12  ;;  %v1086_v32 = vld [vmem:[#allocation6 + $0x144] ss:$8 sps:$4 sm:$0xff]   ;;  %v1088_v34 = vld [vmem:[#allocation6 + $0x74] ss:$8 sps:$4 sm:$0xff]   ;;  %v1084_v35 = vld [vmem:[#allocation6 + $0x140] ss:$8 sps:$4 sm:$0xff]   ;;  %v92_v12 = vlaneseq }
  0x56   :  { %647 = vmatpush1.bf16.msra.mxu1 %v1063_v17  ;;  %v1092_v36 = vld [vmem:[#allocation6 + $0x154] ss:$8 sps:$4 sm:$0xff]   ;;  %v1093_v37 = vld [vmem:[#allocation6 + $0x70] ss:$8 sps:$4 sm:$0xff]   ;;  %v1094_v38 = vld [vmem:[#allocation6 + $0x84] ss:$8 sps:$4 sm:$0xff]  }
  0x57   :  { %648 = vmatprep.subr.bf16.mxu1 %v1064_v18  ;;  %v1090_v39 = vld [vmem:[#allocation6 + $0x150] ss:$8 sps:$4 sm:$0xff]   ;;  %v1098_v40 = vld [vmem:[#allocation6 + $0x164] ss:$8 sps:$4 sm:$0xff]   ;;  %v1099_v41 = vld [vmem:[#allocation6 + $0x80] ss:$8 sps:$4 sm:$0xff]  }
  0x58   :  { %200 = vmatpush1.bf16.msra.mxu0 %v1049_v15  ;;  %v1100_v42 = vld [vmem:[#allocation6 + $0x94] ss:$8 sps:$4 sm:$0xff]   ;;  %v1096_v43 = vld [vmem:[#allocation6 + $0x160] ss:$8 sps:$4 sm:$0xff]   ;;  %v1105_v45 = vld [vmem:[#allocation6 + $0x90] ss:$8 sps:$4 sm:$0xff]  }
  0x59   :  { %683 = vmatprep.subr.bf16.mxu0 %v1062_v16  ;;  %v1104_v44 = vld [vmem:[#allocation6 + $0x174] ss:$8 sps:$4 sm:$0xff]   ;;  %v1106_v46 = vld [vmem:[#allocation6 + $0xa4] ss:$8 sps:$4 sm:$0xff]   ;;  %v1102_v47 = vld [vmem:[#allocation6 + $0x170] ss:$8 sps:$4 sm:$0xff]  }
  0x5a   :  { %649 = vmatpush1.bf16.msra.mxu1 %v1069_v21  ;;  %v1110_v48 = vld [vmem:[#allocation6 + $0x184] ss:$8 sps:$4 sm:$0xff]   ;;  %v1111_v49 = vld [vmem:[#allocation6 + $0xa0] ss:$8 sps:$4 sm:$0xff]   ;;  %v1112_v50 = vld [vmem:[#allocation6 + $0xb4] ss:$8 sps:$4 sm:$0xff]  }
  0x5b   :  { %921 = vmatmul.mubr.msk.bf16.vlgmr.msra.gmra.mrb[4].mxu0 %vm152_vm0, %v81_v8  ;;  %650 = vmatprep.subr.bf16.mxu1 %v1070_v22  ;;  %v1108_v51 = vld [vmem:[#allocation6 + $0x180] ss:$8 sps:$4 sm:$0xff]   ;;  %v1116_v52 = vld [vmem:[#allocation6 + $0x194] ss:$8 sps:$4 sm:$0xff]   ;;  %v1117_v53 = vld [vmem:[#allocation6 + $0xb0] ss:$8 sps:$4 sm:$0xff]  }
  0x5c   :  { %684 = vmatpush1.bf16.msra.mxu0 %v1060_v19  ;;  %v1118_v54 = vld [vmem:[#allocation6 + $0xc4] ss:$8 sps:$4 sm:$0xff]   ;;  %v1114_v55 = vld [vmem:[#allocation6 + $0x190] ss:$8 sps:$4 sm:$0xff]   ;;  %v1123_v57 = vld [vmem:[#allocation6 + $0xc0] ss:$8 sps:$4 sm:$0xff]  }
  0x5d   :  { %685 = vmatprep.subr.bf16.mxu0 %v1068_v20  ;;  %v1122_v56 = vld [vmem:[#allocation6 + $0x1a4] ss:$8 sps:$4 sm:$0xff]   ;;  %v1124_v58 = vld [vmem:[#allocation6 + $0xd4] ss:$8 sps:$4 sm:$0xff]   ;;  %v1120_v59 = vld [vmem:[#allocation6 + $0x1a0] ss:$8 sps:$4 sm:$0xff]  }
  0x5e   :  { %651 = vmatpush1.bf16.msra.mxu1 %v1075_v25  ;;  %v1128_v60 = vld [vmem:[#allocation6 + $0x1b4] ss:$8 sps:$4 sm:$0xff]   ;;  %v1129_v61 = vld [vmem:[#allocation6 + $0xd0] ss:$8 sps:$4 sm:$0xff]   ;;  %v1130_v63 = vld [vmem:[#allocation6 + $0xe4] ss:$8 sps:$4 sm:$0xff]  }
  0x5f   :  { %652 = vmatprep.subr.bf16.mxu1 %v1076_v26  ;;  %v1126_v62 = vld [vmem:[#allocation6 + $0x1b0] ss:$8 sps:$4 sm:$0xff]   ;;  %v1134_v0 = vld [vmem:[#allocation6 + $0x1c4] ss:$8 sps:$4 sm:$0xff]   ;;  %v1132_v1 = vld [vmem:[#allocation6 + $0x1c0] ss:$8 sps:$4 sm:$0xff]  }
  0x60   :  { %686 = vmatpush1.bf16.msra.mxu0 %v1066_v23  ;;  %v1135_v2 = vld [vmem:[#allocation6 + $0xe0] ss:$8 sps:$4 sm:$0xff]   ;;  %v1136_v3 = vld [vmem:[#allocation6 + $0xf4] ss:$8 sps:$4 sm:$0xff]   ;;  %v1138_v5 = vld [vmem:[#allocation6 + $0x1d0] ss:$8 sps:$4 sm:$0xff]  }
  0x61   :  { %687 = vmatprep.subr.bf16.mxu0 %v1074_v24  ;;  %v1140_v4 = vld [vmem:[#allocation6 + $0x1d4] ss:$8 sps:$4 sm:$0xff]   ;;  %v1141_v6 = vld [vmem:[#allocation6 + $0xf0] ss:$8 sps:$4 sm:$0xff]   ;;  %v1144_v7 = vld [vmem:[#allocation6 + $0x1e4] ss:$8 sps:$4 sm:$0xff]  }
  0x62   :  { %653 = vmatpush1.bf16.msra.mxu1 %v1081_v29  ;;  %v1142_v8 = vld [vmem:[#allocation6 + $0x1e0] ss:$8 sps:$4 sm:$0xff]   ;;  %v1147_v9 = vld [vmem:[#allocation6 + $0x1f4] ss:$8 sps:$4 sm:$0xff]   ;;  %v1145_v10 = vld [vmem:[#allocation6 + $0x1f0] ss:$8 sps:$4 sm:$0xff]  }
  0x63   :  { %654 = vmatprep.subr.bf16.mxu1 %v1082_v30  ;;  %v1148_v11 = vld [vmem:[#allocation7 + $0x40] sm:$0xff]   ;;  %v1359_v13 = vshrl.u32 %v92_v12, 7  ;;  %v90_v15 = vld [vmem:[%s1387_s2] sm:$0xf] }
  0x64   :  { %688 = vmatpush1.bf16.msra.mxu0 %v1072_v27 }
  0x65   :  { %689 = vmatprep.subr.bf16.mxu0 %v1080_v28  ;;  %v94_v14 = vsub.s32 0, %v1359_v13  ;;  %v98_v16 = vsub.s32 1, %v1359_v13  ;;  %v102_v22 = vsub.s32 2, %v1359_v13  ;;  %v106_v25 = vsub.s32 3, %v1359_v13  ;;  %v986_v13 = vld [vmem:[%s1391_s6] ss:$0 sm:$0xff] }
  0x66   :  { %655 = vmatpush1.bf16.msra.mxu1 %v1087_v33 }
  0x67   :  { %656 = vmatprep.subr.bf16.mxu1 %v1088_v34  ;;  %v95_v17 = vrot.slane %v90_v15, %v94_v14  ;;  %v99_v18 = vrot.slane %v90_v15, %v98_v16  ;;  %v103_v29 = vrot.slane %v90_v15, %v102_v22  ;;  %v1150_v34 = vld [vmem:[#allocation7 + $0x48] sm:$0xff]  }
  0x68   :  { %690 = vmatpush1.bf16.msra.mxu0 %v1078_v31  ;;  %v107_v31 = vrot.slane %v90_v15, %v106_v25 }
  0x69   :  { %691 = vmatprep.subr.bf16.mxu0 %v1086_v32  ;;  %v1149_v32 = vld [vmem:[#allocation7] sm:$0xff]  }
  0x6a   :  { %657 = vmatpush1.bf16.msra.mxu1 %v1093_v37 }
  0x6b   :  { %658 = vmatprep.subr.bf16.mxu1 %v1094_v38 }
  0x6c   :  { %692 = vmatpush1.bf16.msra.mxu0 %v1084_v35 }
  0x6d   :  { %693 = vmatprep.subr.bf16.mxu0 %v1092_v36 }
  0x6e   :  { %659 = vmatpush1.bf16.msra.mxu1 %v1099_v41 }
  0x6f   :  { %660 = vmatprep.subr.bf16.mxu1 %v1100_v42 }
  0x70   :  { %694 = vmatpush1.bf16.msra.mxu0 %v1090_v39 }
  0x71   :  { %695 = vmatprep.subr.bf16.mxu0 %v1098_v40  ;;  %v1151_v40 = vld [vmem:[#allocation7 + $0x8] sm:$0xff]  }
  0x72   :  { %661 = vmatpush1.bf16.msra.mxu1 %v1105_v45 }
  0x73   :  { %662 = vmatprep.subr.bf16.mxu1 %v1106_v46  ;;  %v1153_v46 = vld [vmem:[#allocation7 + $0x10] sm:$0xff]  }
  0x74   :  { %696 = vmatpush1.bf16.msra.mxu0 %v1096_v43  ;;  %v1152_v43 = vld [vmem:[#allocation7 + $0x50] sm:$0xff]  }
  0x75   :  { %697 = vmatprep.subr.bf16.mxu0 %v1104_v44 }
  0x76   :  { %663 = vmatpush1.bf16.msra.mxu1 %v1111_v49  ;;  %v1155_v49 = vld [vmem:[#allocation7 + $0x18] sm:$0xff]  }
  0x77   :  { %664 = vmatprep.subr.bf16.mxu1 %v1112_v50  ;;  %v1156_v50 = vld [vmem:[#allocation7 + $0x60] sm:$0xff]  }
  0x78   :  { %698 = vmatpush1.bf16.msra.mxu0 %v1102_v47 }
  0x79   :  { %699 = vmatprep.subr.bf16.mxu0 %v1110_v48  ;;  %v1154_v48 = vld [vmem:[#allocation7 + $0x58] sm:$0xff]  }
  0x7a   :  { %665 = vmatpush1.bf16.msra.mxu1 %v1117_v53  ;;  %v1159_v53 = vld [vmem:[#allocation7 + $0x28] sm:$0xff]  }
  0x7b   :  { %666 = vmatprep.subr.bf16.mxu1 %v1118_v54  ;;  %v1160_v54 = vld [vmem:[#allocation7 + $0x70] sm:$0xff]  }
  0x7c   :  { %700 = vmatpush1.bf16.msra.mxu0 %v1108_v51  ;;  %v1157_v51 = vld [vmem:[#allocation7 + $0x20] sm:$0xff]  }
  0x7d   :  { %701 = vmatprep.subr.bf16.mxu0 %v1116_v52  ;;  %v1158_v52 = vld [vmem:[#allocation7 + $0x68] sm:$0xff]  }
  0x7e   :  { %667 = vmatpush1.bf16.msra.mxu1 %v1123_v57  ;;  %v1163_v57 = vld [vmem:[#allocation7 + $0x38] sm:$0xff]  }
  0x7f   :  { %668 = vmatprep.subr.bf16.mxu1 %v1124_v58  ;;  %v310_v58 = vld [vmem:[%s1389_s4] sm:$0x3] }
  0x80   :  { %702 = vmatpush1.bf16.msra.mxu0 %v1114_v55  ;;  %v1161_v55 = vld [vmem:[#allocation7 + $0x30] sm:$0xff]  }
  0x81   :  { %703 = vmatprep.subr.bf16.mxu0 %v1122_v56  ;;  %v1162_v56 = vld [vmem:[#allocation7 + $0x78] sm:$0xff]  }
  0x82   :  { %669 = vmatpush1.bf16.msra.mxu1 %v1129_v61 }
  0x83   :  { %670 = vmatprep.subr.bf16.mxu1 %v1130_v63 }
  0x84   :  { %704 = vmatpush1.bf16.msra.mxu0 %v1120_v59 }
  0x85   :  { %705 = vmatprep.subr.bf16.mxu0 %v1128_v60 }
  0x86   :  { %671 = vmatpush1.bf16.msra.mxu1 %v1135_v2 }
  0x87   :  { %672 = vmatprep.subr.bf16.mxu1 %v1136_v3 }
  0x88   :  { %706 = vmatpush1.bf16.msra.mxu0 %v1126_v62  ;;  %v315_v62 = vrot.slane %v310_v58, %v94_v14 }
  0x89   :  { %707 = vmatprep.subr.bf16.mxu0 %v1134_v0  ;;  %v319_v0 = vrot.slane %v310_v58, %v98_v16 }
  0x8a   :  { %673 = vmatpush1.bf16.msra.mxu1 %v1141_v6 }
  0x8b   :  { %1003 = vmatprep.subr.bf16.mxu1 %v1148_v11 }
  0x8c   :  { %708 = vmatpush1.bf16.msra.mxu0 %v1132_v1 }
  0x8d   :  { %709 = vmatprep.subr.bf16.mxu0 %v1140_v4 }
  0x90   :  { %710 = vmatpush1.bf16.msra.mxu0 %v1138_v5 }
  0x91   :  { %711 = vmatprep.subr.bf16.mxu0 %v1144_v7 }
  0x94   :  { %712 = vmatpush1.bf16.msra.mxu0 %v1142_v8 }
  0x95   :  { %713 = vmatprep.subr.bf16.mxu0 %v1147_v9 }
  0x98   :  { %714 = vmatpush1.bf16.msra.mxu0 %v1145_v10 }
 0x126   :  { %v190_v19 = vpop.f32.mrb[0].mxu0 }
 0x127   :  { %v191_v20 = vadd.f32 %v190_v19, %v95_v17  ;;  %v192_v21 = vpop.f32.mrb[1].mxu0 }
 0x128   :  { %v193_v23 = vadd.f32 %v192_v21, %v99_v18  ;;  %v194_v24 = vpop.f32.mrb[2].mxu0 }
 0x129   :  { %v238_v26 = vmax.f32 %v191_v20, 0.0  ;;  %v195_v27 = vpop.f32.mrb[3].mxu0 }
 0x12a   :  { %v239_v28 = vmax.f32 %v193_v23, 0.0 }
 0x12b   :  { %v242_v33 = vpack.c.bf16 %v238_v26, %v238_v26 }
 0x12c   :  { %v243_v30 = vpack.c.bf16 %v239_v28, %v239_v28 }
 0x12e   :  { %v231_v35 = vpop.f32.mrb[4].mxu0  ;;  %674 = vmatprep.mubr.bf16.mxu1 %v243_v30 }
 0x12f   :  { %v232_v36 = vadd.f32 %v231_v35, %v103_v29  ;;  %v233_v37 = vpop.f32.mrb[5].mxu0  ;;  %675 = vmatmul.mubr.bf16.vlgmr.msra.gmra.mrb[0].mxu1 %v242_v33 }
 0x130   :  { %v234_v38 = vadd.f32 %v233_v37, %v107_v31  ;;  %v235_v39 = vpop.f32.mrb[6].mxu0  ;;  %1004 = vmatpush3.bf16.msra.mxu1 %v1149_v32 }
 0x131   :  { %v240_v41 = vmax.f32 %v232_v36, 0.0  ;;  %v236_v42 = vpop.f32.mrb[7].mxu0  ;;  %1005 = vmatprep.subr.bf16.mxu1 %v1150_v34 }
 0x132   :  { %v241_v44 = vmax.f32 %v234_v38, 0.0 }
 0x133   :  { %v244_v47 = vpack.c.bf16 %v240_v41, %v240_v41 }
 0x134   :  { %v245_v45 = vpack.c.bf16 %v241_v44, %v241_v44  ;;  %1006 = vmatpush3.bf16.msra.mxu1 %v1151_v40 }
 0x135   :  { %1007 = vmatprep.subr.bf16.mxu1 %v1152_v43 }
 0x136   :  { %715 = vmatprep.mubr.bf16.mxu0 %v245_v45 }
 0x137   :  { %716 = vmatmul.mubr.bf16.vlgmr.msra.gmra.mrb[8].mxu0 %v244_v47 }
 0x138   :  { %1008 = vmatpush3.bf16.msra.mxu1 %v1153_v46 }
 0x139   :  { %1009 = vmatprep.subr.bf16.mxu1 %v1154_v48 }
 0x13c   :  { %1010 = vmatpush3.bf16.msra.mxu1 %v1155_v49 }
 0x13d   :  { %1011 = vmatprep.subr.bf16.mxu1 %v1156_v50 }
 0x140   :  { %1012 = vmatpush3.bf16.msra.mxu1 %v1157_v51 }
 0x141   :  { %1013 = vmatprep.subr.bf16.mxu1 %v1158_v52 }
 0x144   :  { %1014 = vmatpush3.bf16.msra.mxu1 %v1159_v53 }
 0x145   :  { %1015 = vmatprep.subr.bf16.mxu1 %v1160_v54 }
 0x148   :  { %1016 = vmatpush3.bf16.msra.mxu1 %v1161_v55 }
 0x149   :  { %1017 = vmatprep.subr.bf16.mxu1 %v1162_v56 }
 0x14c   :  { %1018 = vmatpush3.bf16.msra.mxu1 %v1163_v57 }
 0x202   :  { %v676_v59 = vpop.f32.mrb[0].mxu1 }
 0x203   :  { %v678_v60 = vpop.f32.mrb[1].mxu1  ;;  %v677_v1 = vadd.f32 %v676_v59, %v315_v62 }
 0x204   :  { %v680_v61 = vpop.f32.mrb[2].mxu1  ;;  %v679_v2 = vadd.f32 %v678_v60, %v319_v0 }
 0x205   :  { %v681_v63 = vpop.f32.mrb[3].mxu1 }
 0x20a   :  { %v717_v3 = vpop.f32.mrb[8].mxu0 }
 0x20b   :  { %v718_v4 = vadd.f32 %v717_v3, %v677_v1  ;;  %v719_v5 = vpop.f32.mrb[9].mxu0 }
 0x20c   :  { %v720_v6 = vadd.f32 %v719_v5, %v679_v2  ;;  %v721_v7 = vpop.f32.mrb[10].mxu0 }
 0x20d   :  { %v724_v8 = vmax.f32 %v718_v4, 0.0  ;;  %v722_v9 = vpop.f32.mrb[11].mxu0 }
 0x20e   :  { %v725_v10 = vmax.f32 %v720_v6, 0.0 }
 0x20f   :  { %v726_v12 = vpack.c.bf16 %v724_v8, %v724_v8 }
 0x210   :  { %v727_v11 = vpack.c.bf16 %v725_v10, %v725_v10 }
 0x212   :  { %895 = vmatprep.mubr.bf16.mxu1 %v727_v11 }
 0x213   :  { %896 = vmatmul.mubr.bf16.vlgmr.msra.gmra.mrb[4].mxu1 %v726_v12 }
 0x2e6   :  { %v1019_v15 = vpop.f32.mrb[4].mxu1 }
 0x2e7   :  { %v1020_v14 = vpop.f32.mrb[5].mxu1 }
 0x2e8   :  { %v1021_v16 = vadd.f32 %v1020_v14, %v1019_v15  ;;  %v1022_v17 = vpop.f32.mrb[6].mxu1 }
 0x2e9   :  { %v1023_v18 = vpop.f32.mrb[7].mxu1 }
 0x2ea   :  { %v898_v19 = vadd.f32 %v1021_v16, %v986_v13 }
 0x2ec   :  { %904 = vst.msk [vmem:[%s1392_s7] sm:$0xff] %vm903_vm1, %v898_v19 }
 0x2ed   :  { %909 = vsyncpa [#allocation3], 1 }
 0x2ee   :  { %910 = vsyncpa [#allocation5], 1 }
 0x2ef   :  { %911 = vsyncpa [#allocation8], 1 }

</bundles_post_ra>
